<compile_context>
chip_gen: v7x
topology: tpu7x:2x2x1
jax: 0.10.0
libtpu: 0.0.40
codegen_flags: <defaults>
</compile_context>

<pallas_src>
import jax
import jax.numpy as jnp
from jax.experimental import pallas as pl
from jax.experimental.pallas import tpu as pltpu

HIDDEN = 32
HEADS = 2
BATCH = 2
LN_EPS = 1e-5
NEG_SLOPE = 0.2          # PyG GATConv default negative_slope

# ---- per-chip tuning knobs ----------------------------------------------------
FOLD = 4                 # batch rows folded into lanes (4: v6e/v7x; use 2 on v5e)
BLOCK_ROWS = 1024        # folded-row tile (= FOLD*BLOCK_ROWS logical rows);
                         # use ~512 on v7x (64 MiB VMEM), 512-1024 on v5e
VMEM_LIMIT = 48 * 1024 * 1024


def _leaky(x):
    return jnp.where(x > 0, x, NEG_SLOPE * x)


def _dot(a, b):
    # bf16 MXU inputs, f32 accumulation (matches DEFAULT-precision numerics).
    return jnp.dot(a.astype(jnp.bfloat16), b.astype(jnp.bfloat16),
                   preferred_element_type=jnp.float32)


# ------------------------- host-side constant builders -------------------------
def _block_avg(n, blk):
    # [n, n] block-diagonal 1/blk matrix: x @ M = per-blk-block mean broadcast.
    r = jnp.arange(n)[:, None] // blk
    c = jnp.arange(n)[None, :] // blk
    return (r == c).astype(jnp.float32) / blk


def _block_expand(nblk, width, blk):
    # [nblk, width] 0/1 indicator: w @ M broadcasts column j over lane block j.
    r = jnp.arange(nblk)[:, None]
    c = jnp.arange(width)[None, :] // blk
    return (r == c).astype(jnp.float32)


def _blockdiag(a, b):
    za = jnp.zeros((a.shape[0], b.shape[1]), jnp.float32)
    zb = jnp.zeros((b.shape[0], a.shape[1]), jnp.float32)
    return jnp.block([[a, za], [zb, b]])


def _antidiag(a):
    z = jnp.zeros_like(a)
    return jnp.block([[z, a], [a, z]])


def build_score_matrix(att_src, att_dst, h):
    """[2*heads*h, 4*heads]: maps (audio|text) projected node features (head-major
    lanes) to the four pre-activation edge logits per head, ordered
    [e_aa(heads), e_tt(heads), e_ta(heads), e_at(heads)]."""
    heads = att_src.shape[0]
    hd = heads * h
    sc = jnp.zeros((2 * hd, 4 * heads), jnp.float32)
    for k in range(heads):
        ra = slice(k * h, (k + 1) * h)              # audio rows, head k
        rt = slice(hd + k * h, hd + (k + 1) * h)    # text rows, head k
        a_s, a_d = att_src[k], att_dst[k]
        sc = sc.at[ra, k].set(a_s + a_d)                    # e_aa
        sc = sc.at[rt, heads + k].set(a_s + a_d)            # e_tt
        sc = sc.at[ra, 2 * heads + k].set(a_d)              # e_ta = s_t + d_a
        sc = sc.at[rt, 2 * heads + k].set(a_s)
        sc = sc.at[ra, 3 * heads + k].set(a_s)              # e_at = s_a + d_t
        sc = sc.at[rt, 3 * heads + k].set(a_d)
    return sc


# ------------------------------- Pallas kernel ---------------------------------
def _make_kernel(hidden, heads, fold):
    h2 = 2 * hidden
    hh = 2 * heads * hidden
    fh2, fhh, fH = fold * h2, fold * hh, fold * hidden

    def kernel(x_ref, wp_ref, w1_ref, w1z_ref, w2_ref, w2z_ref, wf_ref,
               qln_ref, pv_ref, out_ref, h1s_ref, h2s_ref):
        tm = x_ref.shape[0]

        # packed small parameter vectors + expand maps: one [16, F*hh] f32 tile
        pv = pv_ref[...]
        bproj, gam, bet = pv[0:1, :fh2], pv[1:2, :fh2], pv[2:3, :fh2]
        b1, b2 = pv[3:4, :fhh], pv[4:5, :fh2]
        bfc, gfc, befc = pv[5:6, :fH], pv[6:7, :fH], pv[7:8, :fH]
        exp1 = pv[8:8 + 2 * heads, :hh]
        exp2 = pv[8 + 2 * heads:10 + 2 * heads, :h2]

        qln = qln_ref[...]                                   # per-H-block mean matrix

        # ---- proj_audio / proj_text: block-diag matmul + per-H LayerNorm + ReLU
        y = _dot(x_ref[...], wp_ref[...]) + bproj            # [tm, F*2H]
        mu = _dot(y, qln)
        dy = y - mu
        var = _dot(dy * dy, qln)
        x1 = jnp.maximum(dy * jax.lax.rsqrt(var + LN_EPS) * gam + bet, 0.0)

        # ---- GAT layer 1: self path for every tile --------------------------
        h1s_ref[...] = _dot(x1, w1_ref[...]) + b1            # [tm, F*hh]

        # cross-modal correction: only global batch row 0 (fold-row 0, fold
        # block 0) has cross edges -> only the first grid tile does this work.
        @pl.when(pl.program_id(0) == 0)
        def _():
            dz = _dot(x1, w1z_ref[...])                      # [tm, hh + 4*heads]
            d1 = dz[:, :hh]
            z1 = _leaky(dz[:, hh:])
            e_s, e_c = z1[:, :2 * heads], z1[:, 2 * heads:]
            m = jnp.maximum(e_s, e_c)
            p_s, p_c = jnp.exp(e_s - m), jnp.exp(e_c - m)
            r0 = (jax.lax.broadcasted_iota(jnp.int32, (tm, 1), 0) == 0)
            wc = p_c * pl.reciprocal(p_s + p_c, approx=True) * r0.astype(jnp.float32)
            h1s_ref[:, :hh] = h1s_ref[:, :hh] + _dot(wc, exp1) * d1

        g1 = jnp.maximum(h1s_ref[...], 0.0)

        # ---- GAT layer 2 (1 head, no activation) -----------------------------
        h2s_ref[...] = _dot(g1, w2_ref[...]) + b2            # [tm, F*2H]

        @pl.when(pl.program_id(0) == 0)
        def _():
            dz2 = _dot(g1, w2z_ref[...])                     # [tm, 2H + 4]
            d2 = dz2[:, :h2]
            z2 = _leaky(dz2[:, h2:])
            e_s2, e_c2 = z2[:, :2], z2[:, 2:]
            m2 = jnp.maximum(e_s2, e_c2)
            p_s2, p_c2 = jnp.exp(e_s2 - m2), jnp.exp(e_c2 - m2)
            r0 = (jax.lax.broadcasted_iota(jnp.int32, (tm, 1), 0) == 0)
            wc2 = p_c2 * pl.reciprocal(p_s2 + p_c2, approx=True) * r0.astype(jnp.float32)
            h2s_ref[:, :h2] = h2s_ref[:, :h2] + _dot(wc2, exp2) * d2

        g2 = h2s_ref[...]

        # ---- node-mean folded into wf; fc Linear + LayerNorm ------------------
        yf = _dot(g2, wf_ref[...]) + bfc                     # [tm, F*H]
        qh = qln_ref[:fH, :fH]                               # same block-mean matrix
        muf = _dot(yf, qh)
        df = yf - muf
        varf = _dot(df * df, qh)
        out_ref[...] = (df * jax.lax.rsqrt(varf + LN_EPS) * gfc + befc
                        ).astype(out_ref.dtype)

    return kernel


# ----------------------------- host-side packing --------------------------------
def pack_params(params, fold):
    (wa, ba, ga, bea, wt, bt, gt, bet,
     w1, b1, as1, ad1, w2, b2, as2, ad2,
     wf, bf, gf, bef) = params
    hid = wa.shape[0]
    heads = as1.shape[0]
    h2, hh = 2 * hid, 2 * heads * hid
    f32, bf16 = jnp.float32, jnp.bfloat16
    hi = jax.lax.Precision.HIGHEST

    wp = _blockdiag(wa, wt)                               # [2H, 2H]
    w1bd = _blockdiag(w1, w1)                             # [2H, hh]
    w1df = _antidiag(w1) - w1bd                           # swapped-half minus self
    s1 = jnp.dot(w1bd, build_score_matrix(as1, ad1, hid), precision=hi)
    w2bd = _blockdiag(w2, w2)                             # [hh, 2H]
    w2df = _antidiag(w2) - w2bd
    s2 = jnp.dot(w2bd, build_score_matrix(as2, ad2, hid), precision=hi)
    wfs = 0.5 * jnp.concatenate([wf, wf], axis=0)         # node mean folded into fc

    eyef = jnp.eye(fold, dtype=f32)
    kron = lambda m: jnp.kron(eyef, m)                    # F-times block-diag
    padr = lambda m, rows: jnp.pad(m, ((0, rows - m.shape[0]), (0, 0)))

    wp_f = kron(wp)                                       # [F*2H, F*2H]
    w1_f = kron(w1bd)                                     # [F*2H, F*hh]
    w1z = jnp.concatenate([padr(w1df, fold * h2),         # cross path, fold block 0
                           padr(s1, fold * h2)], axis=1)  # [F*2H, hh + 4*heads]
    w2_f = kron(w2bd)                                     # [F*hh, F*2H]
    w2z = jnp.concatenate([padr(w2df, fold * hh),
                           padr(s2, fold * hh)], axis=1)  # [F*hh, 2H + 4]
    wf_f = kron(wfs)                                      # [F*2H, F*H]
    qln = _block_avg(fold * h2, hid)                      # LN block-mean matrix

    exp1 = _block_expand(2 * heads, hh, hid)
    exp2 = _block_expand(2, h2, hid)

    width = fold * hh
    catv = lambda *vs: jnp.concatenate([v.reshape(-1) for v in vs])
    foldv = lambda v: jnp.tile(v.reshape(1, -1), (1, fold)).reshape(-1)
    row = lambda v: jnp.pad(v.reshape(-1), (0, width - v.size))

    rows = [
        row(foldv(catv(ba, bt))),      # 0 proj bias
        row(foldv(catv(ga, gt))),      # 1 LN gamma
        row(foldv(catv(bea, bet))),    # 2 LN beta
        row(foldv(catv(b1, b1))),      # 3 gat1 bias
        row(foldv(catv(b2, b2))),      # 4 gat2 bias
        row(foldv(bf)),                # 5 fc bias
        row(foldv(gf)),                # 6 fc LN gamma
        row(foldv(bef)),               # 7 fc LN beta
    ]
    rows += [row(exp1[k]) for k in range(2 * heads)]
    rows += [row(exp2[k]) for k in range(2)]
    pv = jnp.stack(rows)
    pv = jnp.pad(pv, ((0, (-pv.shape[0]) % 8), (0, 0))).astype(f32)

    big = lambda m: m.astype(bf16)     # storage dtype for matmul-only operands
    return (big(wp_f), big(w1_f), big(w1z), big(w2_f), big(w2z), big(wf_f),
            big(qln), pv)


# --------------------------------- wrapper --------------------------------------
def graph_fusion_forward(audio, text, params, *, fold=FOLD, block_rows=BLOCK_ROWS):
    b, hid = audio.shape
    heads = params[10].shape[0]
    h2, fH = 2 * hid, fold * hid

    packed = pack_params(params, fold)

    # lane-fold the batch: [B, 2H] -> [B/F, F*2H]  (bf16 storage for the DMA)
    x = jnp.concatenate([audio, text], axis=-1).astype(jnp.float32)
    bp = pl.cdiv(b, fold) * fold
    if bp != b:
        x = jnp.pad(x, ((0, bp - b), (0, 0)))
    r = bp // fold
    xf = x.reshape(r, fold * h2).astype(jnp.bfloat16)

    if r <= 8:
        tm, rpad = r, r
    else:
        half = pl.cdiv(r, 2)
        tm = min(block_rows, ((half + 7) // 8) * 8)   # >=2 grid steps (megacore)
        rpad = pl.cdiv(r, tm) * tm
        if rpad != r:
            xf = jnp.pad(xf, ((0, rpad - r), (0, 0)))
    grid = (rpad // tm,)

    kernel = _make_kernel(hid, heads, fold)
    w_specs = [pl.BlockSpec(w.shape, lambda i: (0, 0)) for w in packed]

    out = pl.pallas_call(
        kernel,
        out_shape=jax.ShapeDtypeStruct((rpad, fH), jnp.float32),
        grid_spec=pltpu.PrefetchScalarGridSpec(
            num_scalar_prefetch=0,
            grid=grid,
            in_specs=[pl.BlockSpec((tm, fold * h2), lambda i: (i, 0))] + w_specs,
            out_specs=pl.BlockSpec((tm, fH), lambda i: (i, 0)),
            scratch_shapes=[pltpu.VMEM((tm, fold * 2 * heads * hid), jnp.float32),
                            pltpu.VMEM((tm, fold * h2), jnp.float32)],
        ),
        compiler_params=pltpu.CompilerParams(
            dimension_semantics=("parallel",),
            vmem_limit_bytes=VMEM_LIMIT),
    )(xf, *packed)

    return out[:r].reshape(bp, hid)[:b]


# ------------------------------ parameter init ----------------------------------
def init_params(key, d, heads):
    ks = jax.random.split(key, 20)

    def lin_w(k, shape):
        s = 1.0 / jnp.sqrt(jnp.float32(shape[0]))
        return jax.random.uniform(k, shape, jnp.float32, -s, s)

    def vec(k, n, scale=0.1):
        return scale * jax.random.normal(k, (1, n), jnp.float32)

    wa, ba = lin_w(ks[0], (d, d)), vec(ks[1], d)
    ga, bea = 1.0 + vec(ks[2], d), vec(ks[3], d)
    wt, bt = lin_w(ks[4], (d, d)), vec(ks[5], d)
    gt, bet = 1.0 + vec(ks[6], d), vec(ks[7], d)
    w1 = lin_w(ks[8], (d, heads * d))
    b1 = vec(ks[9], heads * d)
    as1 = 0.1 * jax.random.normal(ks[10], (heads, d), jnp.float32)
    ad1 = 0.1 * jax.random.normal(ks[11], (heads, d), jnp.float32)
    w2 = lin_w(ks[12], (heads * d, d))
    b2 = vec(ks[13], d)
    as2 = 0.1 * jax.random.normal(ks[14], (1, d), jnp.float32)
    ad2 = 0.1 * jax.random.normal(ks[15], (1, d), jnp.float32)
    wf, bf = lin_w(ks[16], (d, d)), vec(ks[17], d)
    gf, bef = 1.0 + vec(ks[18], d), vec(ks[19], d)
    return (wa, ba, ga, bea, wt, bt, gt, bet,
            w1, b1, as1, ad1, w2, b2, as2, ad2,
            wf, bf, gf, bef)


# ----------------------------- pure-JAX reference --------------------------------
def _layer_norm(x, gamma, beta):
    mu = jnp.mean(x, axis=-1, keepdims=True)
    var = jnp.mean((x - mu) ** 2, axis=-1, keepdims=True)
    return (x - mu) * jax.lax.rsqrt(var + LN_EPS) * gamma + beta


def _gat_pair(ha, ht, att_src, att_dst, heads, d, is_b0):
    outs_a, outs_t = [], []
    for h in range(heads):
        ha_h = ha[:, h * d:(h + 1) * d]
        ht_h = ht[:, h * d:(h + 1) * d]
        asrc = att_src[h:h + 1, :]
        adst = att_dst[h:h + 1, :]
        s_a = jnp.sum(ha_h * asrc, axis=-1, keepdims=True)
        d_a = jnp.sum(ha_h * adst, axis=-1, keepdims=True)
        s_t = jnp.sum(ht_h * asrc, axis=-1, keepdims=True)
        d_t = jnp.sum(ht_h * adst, axis=-1, keepdims=True)

        e_aa = _leaky(s_a + d_a)
        e_ta = _leaky(s_t + d_a)
        m = jnp.maximum(e_aa, e_ta)
        p_aa, p_ta = jnp.exp(e_aa - m), jnp.exp(e_ta - m)
        coup_a = (p_aa * ha_h + p_ta * ht_h) / (p_aa + p_ta)

        e_tt = _leaky(s_t + d_t)
        e_at = _leaky(s_a + d_t)
        m2 = jnp.maximum(e_tt, e_at)
        p_tt, p_at = jnp.exp(e_tt - m2), jnp.exp(e_at - m2)
        coup_t = (p_tt * ht_h + p_at * ha_h) / (p_tt + p_at)

        outs_a.append(jnp.where(is_b0, coup_a, ha_h))
        outs_t.append(jnp.where(is_b0, coup_t, ht_h))
    if heads == 1:
        return outs_a[0], outs_t[0]
    return jnp.concatenate(outs_a, axis=-1), jnp.concatenate(outs_t, axis=-1)


def reference_forward(audio, text, params):
    (wa, ba, ga, bea, wt, bt, gt, bet,
     w1, b1, as1, ad1, w2, b2, as2, ad2,
     wf, bf, gf, bef) = params
    b, d = audio.shape
    heads = as1.shape[0]
    xa = jnp.maximum(_layer_norm(audio @ wa + ba, ga, bea), 0.0)
    xt = jnp.maximum(_layer_norm(text @ wt + bt, gt, bet), 0.0)
    is_b0 = (jnp.arange(b)[:, None] == 0)
    h1_a, h1_t = xa @ w1, xt @ w1
    g1_a, g1_t = _gat_pair(h1_a, h1_t, as1, ad1, heads, d, is_b0)
    g1_a = jnp.maximum(g1_a + b1, 0.0)
    g1_t = jnp.maximum(g1_t + b1, 0.0)
    h2_a, h2_t = g1_a @ w2, g1_t @ w2
    g2_a, g2_t = _gat_pair(h2_a, h2_t, as2, ad2, 1, d, is_b0)
    fused = 0.5 * ((g2_a + b2) + (g2_t + b2))
    return _layer_norm(fused @ wf + bf, gf, bef)


if __name__ == "__main__":
    key = jax.random.PRNGKey(0)
    k_a, k_t, k_p, k_a2, k_t2 = jax.random.split(key, 5)
    params = init_params(k_p, HIDDEN, HEADS)
    fwd = jax.jit(graph_fusion_forward)

    # module-sized example: batch=2, hidden=32
    audio = jax.random.normal(k_a, (BATCH, HIDDEN), jnp.float32)
    text = jax.random.normal(k_t, (BATCH, HIDDEN), jnp.float32)
    out = jax.block_until_ready(fwd(audio, text, params))
    ref = reference_forward(audio, text, params)
    assert out.shape == (BATCH, HIDDEN)
    # tolerance covers bf16 storage / DEFAULT MXU precision and the EUP
    # approximate reciprocal in the GAT softmax
    assert jnp.allclose(out, ref, rtol=2e-2, atol=2e-2), \
        f"max abs err {float(jnp.max(jnp.abs(out - ref)))}"

    # second shape: exercises fold/row padding, the multi-tile grid and the
    # gated (tile-0-only) cross-modal path
    b2 = 37
    audio2 = jax.random.normal(k_a2, (b2, HIDDEN), jnp.float32)
    text2 = jax.random.normal(k_t2, (b2, HIDDEN), jnp.float32)
    out2 = jax.block_until_ready(fwd(audio2, text2, params))
    ref2 = reference_forward(audio2, text2, params)
    assert jnp.allclose(out2, ref2, rtol=2e-2, atol=2e-2), \
        f"max abs err {float(jnp.max(jnp.abs(out2 - ref2)))}"

    print("KERNEL_OK")
</pallas_src>

<mosaic_0001>
module attributes {stable_mosaic.version = 11 : i64} {
  func.func @kernel(%arg0: i32, %arg1: memref<1x256xbf16, #tpu.memory_space<vmem>>, %arg2: memref<256x256xbf16, #tpu.memory_space<vmem>>, %arg3: memref<256x512xbf16, #tpu.memory_space<vmem>>, %arg4: memref<256x136xbf16, #tpu.memory_space<vmem>>, %arg5: memref<512x256xbf16, #tpu.memory_space<vmem>>, %arg6: memref<512x68xbf16, #tpu.memory_space<vmem>>, %arg7: memref<256x128xbf16, #tpu.memory_space<vmem>>, %arg8: memref<256x256xbf16, #tpu.memory_space<vmem>>, %arg9: memref<16x512xf32, #tpu.memory_space<vmem>>, %arg10: memref<1x128xf32, #tpu.memory_space<vmem>>, %arg11: memref<1x512xf32, #tpu.memory_space<vmem>>, %arg12: memref<1x256xf32, #tpu.memory_space<vmem>>) attributes {dimension_semantics = [#tpu.dimension_semantics<parallel>], iteration_bounds = array<i64: 1>, scalar_prefetch = 0 : i64, scratch_operands = 2 : i64, tpu.core_type = #tpu.core_type<tc>, window_params = [{transform_indices = @transform_0, window_bounds = array<i64: 1, 256>}, {pipeline_mode = #tpu.pipeline_mode<synchronous>, transform_indices = @transform_1, window_bounds = array<i64: 256, 256>}, {pipeline_mode = #tpu.pipeline_mode<synchronous>, transform_indices = @transform_2, window_bounds = array<i64: 256, 512>}, {pipeline_mode = #tpu.pipeline_mode<synchronous>, transform_indices = @transform_3, window_bounds = array<i64: 256, 136>}, {pipeline_mode = #tpu.pipeline_mode<synchronous>, transform_indices = @transform_4, window_bounds = array<i64: 512, 256>}, {pipeline_mode = #tpu.pipeline_mode<synchronous>, transform_indices = @transform_5, window_bounds = array<i64: 512, 68>}, {pipeline_mode = #tpu.pipeline_mode<synchronous>, transform_indices = @transform_6, window_bounds = array<i64: 256, 128>}, {pipeline_mode = #tpu.pipeline_mode<synchronous>, transform_indices = @transform_7, window_bounds = array<i64: 256, 256>}, {pipeline_mode = #tpu.pipeline_mode<synchronous>, transform_indices = @transform_8, window_bounds = array<i64: 16, 512>}, {transform_indices = @transform_9, window_bounds = array<i64: 1, 128>}]} {
    %c0 = arith.constant 0 : index
    %c0_0 = arith.constant 0 : index
    %0 = vector.load %arg9[%c0, %c0_0] : memref<16x512xf32, #tpu.memory_space<vmem>>, vector<16x512xf32>
    %1 = vector.extract_strided_slice %0 {offsets = [0, 0], sizes = [1, 256], strides = [1, 1]} : vector<16x512xf32> to vector<1x256xf32>
    %2 = vector.extract_strided_slice %0 {offsets = [1, 0], sizes = [1, 256], strides = [1, 1]} : vector<16x512xf32> to vector<1x256xf32>
    %3 = vector.extract_strided_slice %0 {offsets = [2, 0], sizes = [1, 256], strides = [1, 1]} : vector<16x512xf32> to vector<1x256xf32>
    %4 = vector.extract_strided_slice %0 {offsets = [3, 0], sizes = [1, 512], strides = [1, 1]} : vector<16x512xf32> to vector<1x512xf32>
    %5 = vector.extract_strided_slice %0 {offsets = [4, 0], sizes = [1, 256], strides = [1, 1]} : vector<16x512xf32> to vector<1x256xf32>
    %6 = vector.extract_strided_slice %0 {offsets = [5, 0], sizes = [1, 128], strides = [1, 1]} : vector<16x512xf32> to vector<1x128xf32>
    %7 = vector.extract_strided_slice %0 {offsets = [6, 0], sizes = [1, 128], strides = [1, 1]} : vector<16x512xf32> to vector<1x128xf32>
    %8 = vector.extract_strided_slice %0 {offsets = [7, 0], sizes = [1, 128], strides = [1, 1]} : vector<16x512xf32> to vector<1x128xf32>
    %9 = vector.extract_strided_slice %0 {offsets = [8, 0], sizes = [4, 128], strides = [1, 1]} : vector<16x512xf32> to vector<4x128xf32>
    %10 = vector.extract_strided_slice %0 {offsets = [12, 0], sizes = [2, 64], strides = [1, 1]} : vector<16x512xf32> to vector<2x64xf32>
    %c0_1 = arith.constant 0 : index
    %c0_2 = arith.constant 0 : index
    %11 = vector.load %arg8[%c0_1, %c0_2] : memref<256x256xbf16, #tpu.memory_space<vmem>>, vector<256x256xbf16>
    %c0_3 = arith.constant 0 : index
    %c0_4 = arith.constant 0 : index
    %12 = vector.load %arg1[%c0_3, %c0_4] : memref<1x256xbf16, #tpu.memory_space<vmem>>, vector<1x256xbf16>
    %c0_5 = arith.constant 0 : index
    %c0_6 = arith.constant 0 : index
    %13 = vector.load %arg2[%c0_5, %c0_6] : memref<256x256xbf16, #tpu.memory_space<vmem>>, vector<256x256xbf16>
    %cst = arith.constant dense<0.000000e+00> : vector<1x256xf32>
    %14 = tpu.matmul %12, %13, %cst {dimension_numbers = #tpu.dot_dimension_numbers<[1], [0], [0], [1], [0, 0, 1, 1], [], []>} : vector<1x256xbf16>, vector<256x256xbf16>, vector<1x256xf32> -> vector<1x256xf32>
    %15 = arith.addf %14, %1 : vector<1x256xf32>
    %16 = arith.truncf %15 : vector<1x256xf32> to vector<1x256xbf16>
    %cst_7 = arith.constant dense<0.000000e+00> : vector<1x256xf32>
    %17 = tpu.matmul %16, %11, %cst_7 {dimension_numbers = #tpu.dot_dimension_numbers<[1], [0], [0], [1], [0, 0, 1, 1], [], []>} : vector<1x256xbf16>, vector<256x256xbf16>, vector<1x256xf32> -> vector<1x256xf32>
    %18 = arith.subf %15, %17 : vector<1x256xf32>
    %19 = arith.mulf %18, %18 : vector<1x256xf32>
    %20 = arith.truncf %19 : vector<1x256xf32> to vector<1x256xbf16>
    %cst_8 = arith.constant dense<0.000000e+00> : vector<1x256xf32>
    %21 = tpu.matmul %20, %11, %cst_8 {dimension_numbers = #tpu.dot_dimension_numbers<[1], [0], [0], [1], [0, 0, 1, 1], [], []>} : vector<1x256xbf16>, vector<256x256xbf16>, vector<1x256xf32> -> vector<1x256xf32>
    %cst_9 = arith.constant 9.99999974E-6 : f32
    %22 = vector.broadcast %cst_9 : f32 to vector<1x256xf32>
    %23 = arith.addf %21, %22 : vector<1x256xf32>
    %24 = math.rsqrt %23 : vector<1x256xf32>
    %25 = arith.mulf %18, %24 : vector<1x256xf32>
    %26 = arith.mulf %25, %2 : vector<1x256xf32>
    %27 = arith.addf %26, %3 : vector<1x256xf32>
    %cst_10 = arith.constant 0.000000e+00 : f32
    %28 = vector.broadcast %cst_10 : f32 to vector<1x256xf32>
    %29 = arith.maximumf %27, %28 : vector<1x256xf32>
    %c0_11 = arith.constant 0 : index
    %c0_12 = arith.constant 0 : index
    %30 = vector.load %arg3[%c0_11, %c0_12] : memref<256x512xbf16, #tpu.memory_space<vmem>>, vector<256x512xbf16>
    %31 = arith.truncf %29 : vector<1x256xf32> to vector<1x256xbf16>
    %cst_13 = arith.constant dense<0.000000e+00> : vector<1x512xf32>
    %32 = tpu.matmul %31, %30, %cst_13 {dimension_numbers = #tpu.dot_dimension_numbers<[1], [0], [0], [1], [0, 0, 1, 1], [], []>} : vector<1x256xbf16>, vector<256x512xbf16>, vector<1x512xf32> -> vector<1x512xf32>
    %33 = arith.addf %32, %4 : vector<1x512xf32>
    %c0_14 = arith.constant 0 : index
    %c0_15 = arith.constant 0 : index
    %34 = vector.load %arg11[%c0_14, %c0_15] : memref<1x512xf32, #tpu.memory_space<vmem>>, vector<1x512xf32>
    tpu.vector_store %arg11[%c0_14, %c0_15], %33 {strides = array<i32>} : memref<1x512xf32, #tpu.memory_space<vmem>>, vector<1x512xf32>,
    %c0_i32 = arith.constant 0 : i32
    %35 = arith.cmpi eq, %arg0, %c0_i32 : i32
    %36 = arith.extui %35 : i1 to i32
    %c0_i32_16 = arith.constant 0 : i32
    %37 = arith.cmpi ne, %36, %c0_i32_16 : i32
    scf.if %37 {
      %c0_39 = arith.constant 0 : index
      %c0_40 = arith.constant 0 : index
      %68 = vector.load %arg4[%c0_39, %c0_40] : memref<256x136xbf16, #tpu.memory_space<vmem>>, vector<256x136xbf16>
      %69 = arith.truncf %29 : vector<1x256xf32> to vector<1x256xbf16>
      %cst_41 = arith.constant dense<0.000000e+00> : vector<1x136xf32>
      %70 = tpu.matmul %69, %68, %cst_41 {dimension_numbers = #tpu.dot_dimension_numbers<[1], [0], [0], [1], [0, 0, 1, 1], [], []>} : vector<1x256xbf16>, vector<256x136xbf16>, vector<1x136xf32> -> vector<1x136xf32>
      %71 = vector.extract_strided_slice %70 {offsets = [0, 0], sizes = [1, 128], strides = [1, 1]} : vector<1x136xf32> to vector<1x128xf32>
      %72 = vector.extract_strided_slice %70 {offsets = [0, 128], sizes = [1, 8], strides = [1, 1]} : vector<1x136xf32> to vector<1x8xf32>
      %cst_42 = arith.constant 0.000000e+00 : f32
      %73 = vector.broadcast %cst_42 : f32 to vector<1x8xf32>
      %74 = arith.cmpf ogt, %72, %73 : vector<1x8xf32>
      %cst_43 = arith.constant 2.000000e-01 : f32
      %75 = vector.broadcast %cst_43 : f32 to vector<1x8xf32>
      %76 = arith.mulf %75, %72 : vector<1x8xf32>
      %77 = arith.select %74, %72, %76 : vector<1x8xi1>, vector<1x8xf32>
      %78 = vector.extract_strided_slice %77 {offsets = [0, 0], sizes = [1, 4], strides = [1, 1]} : vector<1x8xf32> to vector<1x4xf32>
      %79 = vector.extract_strided_slice %77 {offsets = [0, 4], sizes = [1, 4], strides = [1, 1]} : vector<1x8xf32> to vector<1x4xf32>
      %80 = arith.maximumf %78, %79 : vector<1x4xf32>
      %81 = arith.subf %78, %80 : vector<1x4xf32>
      %82 = math.exp %81 : vector<1x4xf32>
      %83 = arith.subf %79, %80 : vector<1x4xf32>
      %84 = math.exp %83 : vector<1x4xf32>
      %85 = tpu.iota {dimensions = array<i32: 0>} : vector<1x1xi32>
      %c0_i32_44 = arith.constant 0 : i32
      %86 = vector.broadcast %c0_i32_44 : i32 to vector<1x1xi32>
      %87 = arith.cmpi eq, %85, %86 : vector<1x1xi32>
      %88 = arith.addf %82, %84 : vector<1x4xf32>
      %89 = tpu.reciprocal %88 {approx = true} : vector<1x4xf32> -> vector<1x4xf32>
      %90 = arith.mulf %84, %89 : vector<1x4xf32>
      %91 = arith.extui %87 : vector<1x1xi1> to vector<1x1xi32>
      %92 = arith.sitofp %91 : vector<1x1xi32> to vector<1x1xf32>
      %93 = vector.broadcast %92 : vector<1x1xf32> to vector<1x4xf32>
      %94 = arith.mulf %90, %93 : vector<1x4xf32>
      %c0_45 = arith.constant 0 : index
      %c0_46 = arith.constant 0 : index
      %95 = vector.load %arg11[%c0_45, %c0_46] : memref<1x512xf32, #tpu.memory_space<vmem>>, vector<1x128xf32>
      %96 = arith.truncf %94 : vector<1x4xf32> to vector<1x4xbf16>
      %97 = arith.truncf %9 : vector<4x128xf32> to vector<4x128xbf16>
      %cst_47 = arith.constant dense<0.000000e+00> : vector<1x128xf32>
      %98 = tpu.matmul %96, %97, %cst_47 {dimension_numbers = #tpu.dot_dimension_numbers<[1], [0], [0], [1], [0, 0, 1, 1], [], []>} : vector<1x4xbf16>, vector<4x128xbf16>, vector<1x128xf32> -> vector<1x128xf32>
      %99 = arith.mulf %98, %71 : vector<1x128xf32>
      %100 = arith.addf %95, %99 : vector<1x128xf32>
      %c0_48 = arith.constant 0 : index
      %c0_49 = arith.constant 0 : index
      %101 = vector.load %arg11[%c0_48, %c0_49] : memref<1x512xf32, #tpu.memory_space<vmem>>, vector<1x128xf32>
      tpu.vector_store %arg11[%c0_48, %c0_49], %100 {strides = array<i32>} : memref<1x512xf32, #tpu.memory_space<vmem>>, vector<1x128xf32>,
    } else {
    }
    %c0_17 = arith.constant 0 : index
    %c0_18 = arith.constant 0 : index
    %38 = vector.load %arg11[%c0_17, %c0_18] : memref<1x512xf32, #tpu.memory_space<vmem>>, vector<1x512xf32>
    %cst_19 = arith.constant 0.000000e+00 : f32
    %39 = vector.broadcast %cst_19 : f32 to vector<1x512xf32>
    %40 = arith.maximumf %38, %39 : vector<1x512xf32>
    %c0_20 = arith.constant 0 : index
    %c0_21 = arith.constant 0 : index
    %41 = vector.load %arg5[%c0_20, %c0_21] : memref<512x256xbf16, #tpu.memory_space<vmem>>, vector<512x256xbf16>
    %42 = arith.truncf %40 : vector<1x512xf32> to vector<1x512xbf16>
    %cst_22 = arith.constant dense<0.000000e+00> : vector<1x256xf32>
    %43 = tpu.matmul %42, %41, %cst_22 {dimension_numbers = #tpu.dot_dimension_numbers<[1], [0], [0], [1], [0, 0, 1, 1], [], []>} : vector<1x512xbf16>, vector<512x256xbf16>, vector<1x256xf32> -> vector<1x256xf32>
    %44 = arith.addf %43, %5 : vector<1x256xf32>
    %c0_23 = arith.constant 0 : index
    %c0_24 = arith.constant 0 : index
    %45 = vector.load %arg12[%c0_23, %c0_24] : memref<1x256xf32, #tpu.memory_space<vmem>>, vector<1x256xf32>
    tpu.vector_store %arg12[%c0_23, %c0_24], %44 {strides = array<i32>} : memref<1x256xf32, #tpu.memory_space<vmem>>, vector<1x256xf32>,
    %c0_i32_25 = arith.constant 0 : i32
    %46 = arith.cmpi eq, %arg0, %c0_i32_25 : i32
    %47 = arith.extui %46 : i1 to i32
    %c0_i32_26 = arith.constant 0 : i32
    %48 = arith.cmpi ne, %47, %c0_i32_26 : i32
    scf.if %48 {
      %c0_39 = arith.constant 0 : index
      %c0_40 = arith.constant 0 : index
      %68 = vector.load %arg6[%c0_39, %c0_40] : memref<512x68xbf16, #tpu.memory_space<vmem>>, vector<512x68xbf16>
      %69 = arith.truncf %40 : vector<1x512xf32> to vector<1x512xbf16>
      %cst_41 = arith.constant dense<0.000000e+00> : vector<1x68xf32>
      %70 = tpu.matmul %69, %68, %cst_41 {dimension_numbers = #tpu.dot_dimension_numbers<[1], [0], [0], [1], [0, 0, 1, 1], [], []>} : vector<1x512xbf16>, vector<512x68xbf16>, vector<1x68xf32> -> vector<1x68xf32>
      %71 = vector.extract_strided_slice %70 {offsets = [0, 0], sizes = [1, 64], strides = [1, 1]} : vector<1x68xf32> to vector<1x64xf32>
      %72 = vector.extract_strided_slice %70 {offsets = [0, 64], sizes = [1, 4], strides = [1, 1]} : vector<1x68xf32> to vector<1x4xf32>
      %cst_42 = arith.constant 0.000000e+00 : f32
      %73 = vector.broadcast %cst_42 : f32 to vector<1x4xf32>
      %74 = arith.cmpf ogt, %72, %73 : vector<1x4xf32>
      %cst_43 = arith.constant 2.000000e-01 : f32
      %75 = vector.broadcast %cst_43 : f32 to vector<1x4xf32>
      %76 = arith.mulf %75, %72 : vector<1x4xf32>
      %77 = arith.select %74, %72, %76 : vector<1x4xi1>, vector<1x4xf32>
      %78 = vector.extract_strided_slice %77 {offsets = [0, 0], sizes = [1, 2], strides = [1, 1]} : vector<1x4xf32> to vector<1x2xf32>
      %79 = vector.extract_strided_slice %77 {offsets = [0, 2], sizes = [1, 2], strides = [1, 1]} : vector<1x4xf32> to vector<1x2xf32>
      %80 = arith.maximumf %78, %79 : vector<1x2xf32>
      %81 = arith.subf %78, %80 : vector<1x2xf32>
      %82 = math.exp %81 : vector<1x2xf32>
      %83 = arith.subf %79, %80 : vector<1x2xf32>
      %84 = math.exp %83 : vector<1x2xf32>
      %85 = tpu.iota {dimensions = array<i32: 0>} : vector<1x1xi32>
      %c0_i32_44 = arith.constant 0 : i32
      %86 = vector.broadcast %c0_i32_44 : i32 to vector<1x1xi32>
      %87 = arith.cmpi eq, %85, %86 : vector<1x1xi32>
      %88 = arith.addf %82, %84 : vector<1x2xf32>
      %89 = tpu.reciprocal %88 {approx = true} : vector<1x2xf32> -> vector<1x2xf32>
      %90 = arith.mulf %84, %89 : vector<1x2xf32>
      %91 = arith.extui %87 : vector<1x1xi1> to vector<1x1xi32>
      %92 = arith.sitofp %91 : vector<1x1xi32> to vector<1x1xf32>
      %93 = vector.broadcast %92 : vector<1x1xf32> to vector<1x2xf32>
      %94 = arith.mulf %90, %93 : vector<1x2xf32>
      %c0_45 = arith.constant 0 : index
      %c0_46 = arith.constant 0 : index
      %95 = vector.load %arg12[%c0_45, %c0_46] : memref<1x256xf32, #tpu.memory_space<vmem>>, vector<1x64xf32>
      %96 = arith.truncf %94 : vector<1x2xf32> to vector<1x2xbf16>
      %97 = arith.truncf %10 : vector<2x64xf32> to vector<2x64xbf16>
      %cst_47 = arith.constant dense<0.000000e+00> : vector<1x64xf32>
      %98 = tpu.matmul %96, %97, %cst_47 {dimension_numbers = #tpu.dot_dimension_numbers<[1], [0], [0], [1], [0, 0, 1, 1], [], []>} : vector<1x2xbf16>, vector<2x64xbf16>, vector<1x64xf32> -> vector<1x64xf32>
      %99 = arith.mulf %98, %71 : vector<1x64xf32>
      %100 = arith.addf %95, %99 : vector<1x64xf32>
      %c0_48 = arith.constant 0 : index
      %c0_49 = arith.constant 0 : index
      %101 = vector.load %arg12[%c0_48, %c0_49] : memref<1x256xf32, #tpu.memory_space<vmem>>, vector<1x64xf32>
      tpu.vector_store %arg12[%c0_48, %c0_49], %100 {strides = array<i32>} : memref<1x256xf32, #tpu.memory_space<vmem>>, vector<1x64xf32>,
    } else {
    }
    %c0_27 = arith.constant 0 : index
    %c0_28 = arith.constant 0 : index
    %49 = vector.load %arg12[%c0_27, %c0_28] : memref<1x256xf32, #tpu.memory_space<vmem>>, vector<1x256xf32>
    %c0_29 = arith.constant 0 : index
    %c0_30 = arith.constant 0 : index
    %50 = vector.load %arg7[%c0_29, %c0_30] : memref<256x128xbf16, #tpu.memory_space<vmem>>, vector<256x128xbf16>
    %51 = arith.truncf %49 : vector<1x256xf32> to vector<1x256xbf16>
    %cst_31 = arith.constant dense<0.000000e+00> : vector<1x128xf32>
    %52 = tpu.matmul %51, %50, %cst_31 {dimension_numbers = #tpu.dot_dimension_numbers<[1], [0], [0], [1], [0, 0, 1, 1], [], []>} : vector<1x256xbf16>, vector<256x128xbf16>, vector<1x128xf32> -> vector<1x128xf32>
    %53 = arith.addf %52, %6 : vector<1x128xf32>
    %c0_32 = arith.constant 0 : index
    %c0_33 = arith.constant 0 : index
    %54 = vector.load %arg8[%c0_32, %c0_33] : memref<256x256xbf16, #tpu.memory_space<vmem>>, vector<128x128xbf16>
    %55 = arith.truncf %53 : vector<1x128xf32> to vector<1x128xbf16>
    %cst_34 = arith.constant dense<0.000000e+00> : vector<1x128xf32>
    %56 = tpu.matmul %55, %54, %cst_34 {dimension_numbers = #tpu.dot_dimension_numbers<[1], [0], [0], [1], [0, 0, 1, 1], [], []>} : vector<1x128xbf16>, vector<128x128xbf16>, vector<1x128xf32> -> vector<1x128xf32>
    %57 = arith.subf %53, %56 : vector<1x128xf32>
    %58 = arith.mulf %57, %57 : vector<1x128xf32>
    %59 = arith.truncf %58 : vector<1x128xf32> to vector<1x128xbf16>
    %cst_35 = arith.constant dense<0.000000e+00> : vector<1x128xf32>
    %60 = tpu.matmul %59, %54, %cst_35 {dimension_numbers = #tpu.dot_dimension_numbers<[1], [0], [0], [1], [0, 0, 1, 1], [], []>} : vector<1x128xbf16>, vector<128x128xbf16>, vector<1x128xf32> -> vector<1x128xf32>
    %cst_36 = arith.constant 9.99999974E-6 : f32
    %61 = vector.broadcast %cst_36 : f32 to vector<1x128xf32>
    %62 = arith.addf %60, %61 : vector<1x128xf32>
    %63 = math.rsqrt %62 : vector<1x128xf32>
    %64 = arith.mulf %57, %63 : vector<1x128xf32>
    %65 = arith.mulf %64, %7 : vector<1x128xf32>
    %66 = arith.addf %65, %8 : vector<1x128xf32>
    %c0_37 = arith.constant 0 : index
    %c0_38 = arith.constant 0 : index
    %67 = vector.load %arg10[%c0_37, %c0_38] : memref<1x128xf32, #tpu.memory_space<vmem>>, vector<1x128xf32>
    tpu.vector_store %arg10[%c0_37, %c0_38], %66 {strides = array<i32>} : memref<1x128xf32, #tpu.memory_space<vmem>>, vector<1x128xf32>,
    return
  }
  func.func @transform_0(%arg0: i32) -> (i32, i32) {
    %c0_i32 = arith.constant 0 : i32
    %c0_i32_0 = arith.constant 0 : i32
    return %arg0, %c0_i32 : i32, i32
  }
  func.func @transform_1(%arg0: i32) -> (i32, i32) {
    %c0_i32 = arith.constant 0 : i32
    %c0_i32_0 = arith.constant 0 : i32
    %c0_i32_1 = arith.constant 0 : i32
    return %c0_i32, %c0_i32_0 : i32, i32
  }
  func.func @transform_2(%arg0: i32) -> (i32, i32) {
    %c0_i32 = arith.constant 0 : i32
    %c0_i32_0 = arith.constant 0 : i32
    %c0_i32_1 = arith.constant 0 : i32
    return %c0_i32, %c0_i32_0 : i32, i32
  }
  func.func @transform_3(%arg0: i32) -> (i32, i32) {
    %c0_i32 = arith.constant 0 : i32
    %c0_i32_0 = arith.constant 0 : i32
    %c0_i32_1 = arith.constant 0 : i32
    return %c0_i32, %c0_i32_0 : i32, i32
  }
  func.func @transform_4(%arg0: i32) -> (i32, i32) {
    %c0_i32 = arith.constant 0 : i32
    %c0_i32_0 = arith.constant 0 : i32
    %c0_i32_1 = arith.constant 0 : i32
    return %c0_i32, %c0_i32_0 : i32, i32
  }
  func.func @transform_5(%arg0: i32) -> (i32, i32) {
    %c0_i32 = arith.constant 0 : i32
    %c0_i32_0 = arith.constant 0 : i32
    %c0_i32_1 = arith.constant 0 : i32
    return %c0_i32, %c0_i32_0 : i32, i32
  }
  func.func @transform_6(%arg0: i32) -> (i32, i32) {
    %c0_i32 = arith.constant 0 : i32
    %c0_i32_0 = arith.constant 0 : i32
    %c0_i32_1 = arith.constant 0 : i32
    return %c0_i32, %c0_i32_0 : i32, i32
  }
  func.func @transform_7(%arg0: i32) -> (i32, i32) {
    %c0_i32 = arith.constant 0 : i32
    %c0_i32_0 = arith.constant 0 : i32
    %c0_i32_1 = arith.constant 0 : i32
    return %c0_i32, %c0_i32_0 : i32, i32
  }
  func.func @transform_8(%arg0: i32) -> (i32, i32) {
    %c0_i32 = arith.constant 0 : i32
    %c0_i32_0 = arith.constant 0 : i32
    %c0_i32_1 = arith.constant 0 : i32
    return %c0_i32, %c0_i32_0 : i32, i32
  }
  func.func @transform_9(%arg0: i32) -> (i32, i32) {
    %c0_i32 = arith.constant 0 : i32
    %c0_i32_0 = arith.constant 0 : i32
    return %arg0, %c0_i32 : i32, i32
  }
}

</mosaic_0001>

<bundles_post_ra>
// kernel: tile.38
= control target key start
LH: loop header
LB: loop body
LE: loop exit
PB: predicated region body
PF: predicated region fallthrough
CT: control target
= control target key end

     0   :  { %s6_s8 = smov 3  ;;  %vm8_vm0 = vcmask 523264   ;;  %s24_s9 = smov 64   ;;  %vm15_vm1 = vcmask 1048064   ;;  %s41_s0 = inlined_call_operand.vmem [shape: f32[4,64], index: 0, kind: input, shape index: {}]   ;;  %s42_s1 = inlined_call_operand.vmem [shape: f32[256], index: 1, kind: output, shape index: {}]  }
   0x1   :  { %v4_v0 = vld [vmem:[%s41_s0] sm:$0xf]  ;;  %s11_s0 = smov 3 }
   0x2   :  { %5 = vst [vmem:[#allocation1] sm:$0xf] %v4_v0 }
   0x9   :  { %v12_v1 = vld [vmem:[#allocation1 + $0x1] ss:$2 sm:%s11_s0]   ;;  %v7_v2 = vld [vmem:[#allocation1] ss:$2 sm:%s6_s8]  }
   0xa   :  { %13 = vrot.lane.b32.xlu0 %v12_v1, %s24_s9  ;;  %9 = vst.msk [vmem:[#allocation0] sm:$0x3] %vm8_vm0, %v7_v2  }
  0x7c   :  { %v14_v3 = vpop.permute.xlu0 %13  }
  0x7d   :  { %16 = vst.msk [vmem:[#allocation0] sm:$0x3] %vm15_vm1, %v14_v3  }
  0x84   :  { %v20_v4 = vld [vmem:[#allocation0] sm:$0x3] }
  0x85   :  { %22 = vst [vmem:[%s42_s1] sm:$0x3] %v20_v4 }

// kernel: tile.59
= control target key start
LH: loop header
LB: loop body
LE: loop exit
PB: predicated region body
PF: predicated region fallthrough
CT: control target
= control target key end

     0   :  { %vm7_vm0 = vcmask 261120   ;;  %s37_s8 = smov 32   ;;  %s38_s9 = smov 64   ;;  %vm13_vm1 = vcmask 1048320   ;;  %vm19_vm2 = vcmask 785920   ;;  %vm25_vm3 = vcmask 523520   ;;  %s55_s0 = inlined_call_operand.vmem [shape: f32[4,32], index: 0, kind: input, shape index: {}]   ;;  %s56_s1 = inlined_call_operand.vmem [shape: f32[128], index: 1, kind: output, shape index: {}]  }
   0x1   :  { %v4_v0 = vld [vmem:[%s55_s0] sm:$0xf]  ;;  %s36_s0 = smov 96  }
   0x2   :  { %5 = vst [vmem:[#allocation1] sm:$0xf] %v4_v0 }
   0x9   :  { %v10_v1 = vld [vmem:[#allocation1 + $0x3] sm:$0x1]   ;;  %v22_v2 = vld [vmem:[#allocation1 + $0x1] sm:$0x1]   ;;  %v6_v3 = vld [vmem:[#allocation1] sm:$0x1]  }
   0xa   :  { %11 = vrot.lane.b32.xlu0 %v10_v1, %s36_s0  ;;  %23 = vrot.lane.b32.xlu1 %v22_v2, %s37_s8  ;;  %v16_v4 = vld [vmem:[#allocation1 + $0x2] sm:$0x1]   ;;  %8 = vst.msk [vmem:[#allocation0] sm:$0x1] %vm7_vm0, %v6_v3  }
   0xe   :  { %17 = vrot.lane.b32.xlu0 %v16_v4, %s38_s9 }
  0x7c   :  { %v12_v5 = vpop.permute.xlu0 %11   ;;  %v24_v6 = vpop.permute.xlu1 %23  }
  0x7d   :  { %14 = vst.msk [vmem:[#allocation0] sm:$0x1] %vm13_vm1, %v12_v5  }
  0x80   :  { %v18_v7 = vpop.permute.xlu0 %17  }
  0x81   :  { %20 = vst.msk [vmem:[#allocation0] sm:$0x1] %vm19_vm2, %v18_v7  }
  0x82   :  { %26 = vst.msk [vmem:[#allocation0] sm:$0x1] %vm25_vm3, %v24_v6  }
  0x89   :  { %v30_v8 = vld [vmem:[#allocation0] sm:$0x1] }
  0x8a   :  { %32 = vst [vmem:[%s56_s1] sm:$0x1] %v30_v8 }

</bundles_post_ra>
